<compile_context>
chip_gen: v5e
topology: v5e:2x2
jax: 0.10.0
libtpu: 0.0.40
codegen_flags: <defaults>
</compile_context>

<pallas_src>
import functools

import jax
import jax.numpy as jnp
from jax.experimental import pallas as pl
from jax.experimental.pallas import tpu as pltpu


# ---------------------------------------------------------------------------
# Parameter setup — mirrors BQuantConv1d_cpu1.__init__ (linear=False path)
# ---------------------------------------------------------------------------
def bquant_init(w0, k=8, method="sup"):
    """w0: (nx, nf).  Returns scale (k, nf) f32 and binary (k, nx//8, nf) uint8."""
    m, n = w0.shape
    assert m % 8 == 0, "nx must be divisible by 8"
    binary_exp = (2.0 ** jnp.arange(7, -1, -1)).astype(w0.dtype)  # [128,...,1]
    scales, packs = [], []
    w = w0
    for _ in range(k):
        absw = jnp.abs(w)
        sign = w > 0
        if method == "sup":
            s = (jnp.min(absw, axis=0) + jnp.max(absw, axis=0)) / 2.0
        elif method == "l2":
            s = jnp.mean(absw, axis=0)
        else:
            raise ValueError(method)
        scales.append(s)
        b = jnp.where(sign, 1.0, 0.0).astype(w.dtype).reshape(m // 8, 8, n)
        packed = jnp.einsum("i,gin->gn", binary_exp, b).astype(jnp.uint8)
        packs.append(packed)
        w = w - jnp.where(sign, s[None, :], -s[None, :])
    scale = jnp.stack(scales, axis=0)   # (k, nf)
    binary = jnp.stack(packs, axis=0)   # (k, nx//8, nf) uint8
    return scale, binary


def decode_signs(binary):
    """(k, nx//8, nf) uint8 packed bits -> (k, nx, nf) float32 of ±1.
    Byte bit (7 - i) holds the sign of row g*8 + i (matches __init__ packing
    and the forward's MakeTable/map4 indexing)."""
    k, g, n = binary.shape
    shifts = jnp.arange(7, -1, -1, dtype=jnp.int32)               # rows 0..7
    bits = (binary[:, :, None, :].astype(jnp.int32) >> shifts[None, None, :, None]) & 1
    signs = (bits * 2 - 1).astype(jnp.float32)                    # ±1
    return signs.reshape(k, g * 8, n)


def fold_weights(scale, binary, bits=None):
    """Fold the per-bit structure once: W_eff[m, n] = sum_k scale[k, n] * signs[k, m, n]."""
    if bits is not None:
        scale = scale[:bits]
        binary = binary[:bits]
    signs = decode_signs(binary)                                  # (k, nx, nf)
    return jnp.einsum("kn,kmn->mn", scale, signs).astype(jnp.float32)  # (nx, nf)


# ---------------------------------------------------------------------------
# Pallas kernel: tiled  out = x @ W_eff + bias
# ---------------------------------------------------------------------------
def _matmul_bias_kernel(x_ref, w_ref, b_ref, o_ref):
    kk = pl.program_id(2)

    @pl.when(kk == 0)
    def _():
        o_ref[...] = jnp.zeros_like(o_ref)

    # MXU matmul tile; accumulate directly into the resident f32 output block.
    o_ref[...] += jnp.dot(x_ref[...], w_ref[...], preferred_element_type=jnp.float32)

    @pl.when(kk == pl.num_programs(2) - 1)
    def _():
        o_ref[...] += b_ref[...]    # (1, tn) broadcasts over (tm, tn)


def _round_up(x, m):
    return ((x + m - 1) // m) * m


@functools.partial(jax.jit, static_argnames=("tm_pref", "tn_pref", "tk_pref"))
def _bquant_matmul(xf, w_eff, bias, tm_pref=512, tn_pref=512, tk_pref=512):
    """xf: (M, K) f32, w_eff: (K, N) f32, bias: (N,) f32 -> (M, N) f32."""
    M, K = xf.shape
    K2, N = w_eff.shape
    assert K == K2

    # Minimal (8, 128)-legal padding, then tile sizes capped at 512.
    m8 = _round_up(M, 8)
    n128 = _round_up(N, 128)
    k128 = _round_up(K, 128)
    tm = min(tm_pref, m8)
    tn = min(tn_pref, n128)
    tk = min(tk_pref, k128)
    Mp = _round_up(m8, tm)
    Np = _round_up(n128, tn)
    Kp = _round_up(k128, tk)

    xp = jnp.pad(xf, ((0, Mp - M), (0, Kp - K)))
    wp = jnp.pad(w_eff, ((0, Kp - K), (0, Np - N)))
    bp = jnp.pad(bias, (0, Np - N)).reshape(1, Np)

    grid = (Mp // tm, Np // tn, Kp // tk)

    cost = pl.CostEstimate(
        flops=2 * Mp * Kp * Np,
        transcendentals=0,
        bytes_accessed=4 * (Mp * Kp + Kp * Np * grid[0] + Mp * Np + Np),
    )

    out = pl.pallas_call(
        _matmul_bias_kernel,
        out_shape=jax.ShapeDtypeStruct((Mp, Np), jnp.float32),
        grid_spec=pltpu.PrefetchScalarGridSpec(
            num_scalar_prefetch=0,
            grid=grid,
            in_specs=[
                pl.BlockSpec((tm, tk), lambda i, j, k: (i, k)),   # x tile
                pl.BlockSpec((tk, tn), lambda i, j, k: (k, j)),   # W_eff tile
                pl.BlockSpec((1, tn), lambda i, j, k: (0, j)),    # bias tile
            ],
            out_specs=pl.BlockSpec((tm, tn), lambda i, j, k: (i, j)),
        ),
        compiler_params=pltpu.CompilerParams(
            dimension_semantics=("parallel", "parallel", "arbitrary"),
        ),
        cost_estimate=cost,
    )(xp, wp, bp)

    return out[:M, :N]


def bquant_forward(x, w_eff, bias):
    """x: (..., nx) f32 -> (..., nf) f32 using the folded effective weight."""
    nx, nf = w_eff.shape
    size_out = x.shape[:-1] + (nf,)
    xf = x.reshape(-1, nx).astype(jnp.float32)
    out = _bquant_matmul(xf, w_eff, bias.astype(jnp.float32))
    return out.reshape(size_out)


# ---------------------------------------------------------------------------
# Reference (plain JAX, per-bit formula as in the PyTorch forward)
# ---------------------------------------------------------------------------
def bquant_reference(x, scale, binary, bias, nf, bits=8):
    nx = x.shape[-1]
    xf = x.reshape(-1, nx)
    signs = decode_signs(binary[:bits])                 # (bits, nx, nf)
    per_bit = jnp.einsum("bm,kmn->kbn", xf, signs)      # (bits, B, nf)
    out = jnp.sum(per_bit * scale[:bits, None, :], axis=0) + bias[None, :]
    return out.reshape(x.shape[:-1] + (nf,))


if __name__ == "__main__":
    key = jax.random.PRNGKey(0)
    k_w, k_b, k_x = jax.random.split(key, 3)

    nx, nf, bits = 64, 128, 8
    # emulate a GPT-2 style Conv1D: weight (nx, nf), bias (nf,)
    w0 = jax.random.normal(k_w, (nx, nf), dtype=jnp.float32) * 0.1
    bias = jax.random.normal(k_b, (nf,), dtype=jnp.float32) * 0.01

    scale, binary = bquant_init(w0, k=bits, method="sup")
    w_eff = fold_weights(scale, binary, bits=bits)      # built once at "init"

    # input: (batch=2, seq=8, nx=64); forward flattens leading dims
    x = jax.random.normal(k_x, (2, 8, nx), dtype=jnp.float32)

    out = bquant_forward(x, w_eff, bias)
    out = jax.block_until_ready(out)

    ref = bquant_reference(x, scale, binary, bias, nf, bits=bits)
    assert out.shape == (2, 8, nf), out.shape
    assert jnp.allclose(out, ref, atol=1e-4, rtol=1e-4), "mismatch vs reference"

    print("KERNEL_OK")
</pallas_src>

<mosaic_0001>
module attributes {stable_mosaic.version = 11 : i64} {
  func.func @_matmul_bias_kernel(%arg0: i32, %arg1: i32, %arg2: i32, %arg3: memref<16x128xf32, #tpu.memory_space<vmem>>, %arg4: memref<128x128xf32, #tpu.memory_space<vmem>>, %arg5: memref<1x128xf32, #tpu.memory_space<vmem>>, %arg6: memref<16x128xf32, #tpu.memory_space<vmem>>) attributes {dimension_semantics = [#tpu.dimension_semantics<parallel>, #tpu.dimension_semantics<parallel>, #tpu.dimension_semantics<arbitrary>], iteration_bounds = array<i64: 1, 1, 1>, scalar_prefetch = 0 : i64, scratch_operands = 0 : i64, tpu.core_type = #tpu.core_type<tc>, window_params = [{transform_indices = @transform_0, window_bounds = array<i64: 16, 128>}, {transform_indices = @transform_1, window_bounds = array<i64: 128, 128>}, {transform_indices = @transform_2, window_bounds = array<i64: 1, 128>}, {transform_indices = @transform_3, window_bounds = array<i64: 16, 128>}]} {
    %c0_i32 = arith.constant 0 : i32
    %0 = arith.cmpi eq, %arg2, %c0_i32 : i32
    %1 = arith.extui %0 : i1 to i32
    %c0_i32_0 = arith.constant 0 : i32
    %2 = arith.cmpi ne, %1, %c0_i32_0 : i32
    scf.if %2 {
      %cst_10 = arith.constant 0.000000e+00 : f32
      %12 = vector.broadcast %cst_10 : f32 to vector<16x128xf32>
      %c0_11 = arith.constant 0 : index
      %c0_12 = arith.constant 0 : index
      %13 = vector.load %arg6[%c0_11, %c0_12] : memref<16x128xf32, #tpu.memory_space<vmem>>, vector<16x128xf32>
      tpu.vector_store %arg6[%c0_11, %c0_12], %12 {strides = array<i32>} : memref<16x128xf32, #tpu.memory_space<vmem>>, vector<16x128xf32>,
    } else {
    }
    %c0 = arith.constant 0 : index
    %c0_1 = arith.constant 0 : index
    %3 = vector.load %arg6[%c0, %c0_1] : memref<16x128xf32, #tpu.memory_space<vmem>>, vector<16x128xf32>
    %c0_2 = arith.constant 0 : index
    %c0_3 = arith.constant 0 : index
    %4 = vector.load %arg3[%c0_2, %c0_3] : memref<16x128xf32, #tpu.memory_space<vmem>>, vector<16x128xf32>
    %c0_4 = arith.constant 0 : index
    %c0_5 = arith.constant 0 : index
    %5 = vector.load %arg4[%c0_4, %c0_5] : memref<128x128xf32, #tpu.memory_space<vmem>>, vector<128x128xf32>
    %cst = arith.constant dense<0.000000e+00> : vector<16x128xf32>
    %6 = tpu.matmul %4, %5, %cst {dimension_numbers = #tpu.dot_dimension_numbers<[1], [0], [0], [1], [0, 0, 1, 1], [], []>} : vector<16x128xf32>, vector<128x128xf32>, vector<16x128xf32> -> vector<16x128xf32>
    %7 = arith.addf %3, %6 : vector<16x128xf32>
    %c0_6 = arith.constant 0 : index
    %c0_7 = arith.constant 0 : index
    %8 = vector.load %arg6[%c0_6, %c0_7] : memref<16x128xf32, #tpu.memory_space<vmem>>, vector<16x128xf32>
    tpu.vector_store %arg6[%c0_6, %c0_7], %7 {strides = array<i32>} : memref<16x128xf32, #tpu.memory_space<vmem>>, vector<16x128xf32>,
    %c0_i32_8 = arith.constant 0 : i32
    %9 = arith.cmpi eq, %arg2, %c0_i32_8 : i32
    %10 = arith.extui %9 : i1 to i32
    %c0_i32_9 = arith.constant 0 : i32
    %11 = arith.cmpi ne, %10, %c0_i32_9 : i32
    scf.if %11 {
      %c0_10 = arith.constant 0 : index
      %c0_11 = arith.constant 0 : index
      %12 = vector.load %arg6[%c0_10, %c0_11] : memref<16x128xf32, #tpu.memory_space<vmem>>, vector<16x128xf32>
      %c0_12 = arith.constant 0 : index
      %c0_13 = arith.constant 0 : index
      %13 = vector.load %arg5[%c0_12, %c0_13] : memref<1x128xf32, #tpu.memory_space<vmem>>, vector<1x128xf32>
      %14 = vector.broadcast %13 : vector<1x128xf32> to vector<16x128xf32>
      %15 = arith.addf %12, %14 : vector<16x128xf32>
      %c0_14 = arith.constant 0 : index
      %c0_15 = arith.constant 0 : index
      %16 = vector.load %arg6[%c0_14, %c0_15] : memref<16x128xf32, #tpu.memory_space<vmem>>, vector<16x128xf32>
      tpu.vector_store %arg6[%c0_14, %c0_15], %15 {strides = array<i32>} : memref<16x128xf32, #tpu.memory_space<vmem>>, vector<16x128xf32>,
    } else {
    }
    return
  }
  func.func @transform_0(%arg0: i32, %arg1: i32, %arg2: i32) -> (i32, i32) {
    %c0_i32 = arith.constant 0 : i32
    return %arg0, %arg2 : i32, i32
  }
  func.func @transform_1(%arg0: i32, %arg1: i32, %arg2: i32) -> (i32, i32) {
    %c0_i32 = arith.constant 0 : i32
    return %arg2, %arg1 : i32, i32
  }
  func.func @transform_2(%arg0: i32, %arg1: i32, %arg2: i32) -> (i32, i32) {
    %c0_i32 = arith.constant 0 : i32
    %c0_i32_0 = arith.constant 0 : i32
    return %c0_i32, %arg1 : i32, i32
  }
  func.func @transform_3(%arg0: i32, %arg1: i32, %arg2: i32) -> (i32, i32) {
    %c0_i32 = arith.constant 0 : i32
    return %arg0, %arg1 : i32, i32
  }
}

</mosaic_0001>

<bundles_post_ra>
// kernel: _bquant_matmul.1
= control target key start
LH: loop header
LB: loop body
LE: loop exit
PB: predicated region body
PF: predicated region fallthrough
CT: control target
= control target key end

     0   :  { %s229_s0 = inlined_call_operand.vmem [shape: f32[16,128], index: 0, kind: input, shape index: {}]   ;;  %s230_s1 = inlined_call_operand.vmem [shape: f32[128,128], index: 1, kind: input, shape index: {}]   ;;  %s231_s2 = inlined_call_operand.vmem [shape: f32[1,128], index: 2, kind: input, shape index: {}]   ;;  %s232_s3 = inlined_call_operand.hbm [shape: f32[16,128], index: 3, kind: output, shape index: {}]  }
   0x1   :  { %v40_v0 = vld [vmem:[%s230_s1 + $0x78] sm:$0xff]  ;;  %v39_v1 = vld [vmem:[%s230_s1 + $0x70] sm:$0xff]  ;;  %v38_v2 = vld [vmem:[%s230_s1 + $0x68] sm:$0xff] }
   0x2   :  { %41 = vmatpush.msra.mxu0 %v40_v0  ;;  %99 = vmatpush.msra.mxu1 %v40_v0  ;;  %v37_v3 = vld [vmem:[%s230_s1 + $0x60] sm:$0xff]  ;;  %v36_v4 = vld [vmem:[%s230_s1 + $0x58] sm:$0xff] }
   0x4   :  { %42 = vmatpush.msra.mxu0 %v39_v1  ;;  %100 = vmatpush.msra.mxu1 %v39_v1 }
   0x6   :  { %43 = vmatpush.msra.mxu0 %v38_v2  ;;  %101 = vmatpush.msra.mxu1 %v38_v2 }
   0x7   :  { %8 = vsyncpa [#allocation3], 0  ;;  %v35_v5 = vld [vmem:[%s230_s1 + $0x50] sm:$0xff]  ;;  %v34_v6 = vld [vmem:[%s230_s1 + $0x48] sm:$0xff]  ;;  %s87_s26 = sshll.u32 %s232_s3, 4  ;;  %s148_s27 = smov 8   ;;  %s88_s26 = int_to_ptr.hbm [resolvable:$true] %s87_s26 }
   0x8   :  { %44 = vmatpush.msra.mxu0 %v37_v3  ;;  %102 = vmatpush.msra.mxu1 %v37_v3  ;;  %v33_v7 = vld [vmem:[%s230_s1 + $0x40] sm:$0xff]  ;;  %v32_v8 = vld [vmem:[%s230_s1 + $0x38] sm:$0xff]  ;;  %v31_v9 = vld [vmem:[%s230_s1 + $0x30] sm:$0xff] }
   0x9   :  { %v30_v10 = vld [vmem:[%s230_s1 + $0x28] sm:$0xff]  ;;  %v29_v11 = vld [vmem:[%s230_s1 + $0x20] sm:$0xff]  ;;  %v28_v12 = vld [vmem:[%s230_s1 + $0x18] sm:$0xff] }
   0xa   :  { %45 = vmatpush.msra.mxu0 %v36_v4  ;;  %103 = vmatpush.msra.mxu1 %v36_v4  ;;  %v27_v13 = vld [vmem:[%s230_s1 + $0x10] sm:$0xff]  ;;  %v26_v14 = vld [vmem:[%s230_s1 + $0x8] sm:$0xff]  ;;  %v25_v15 = vld [vmem:[%s230_s1] sm:$0xff]  ;;  %s146_s1 = smov [#allocation2]  }
   0xb   :  { %v23_v16 = vld [vmem:[%s229_s0] sm:$0xff]  ;;  %v24_v17 = vld [vmem:[%s229_s0 + $0x8] sm:$0xff]  ;;  %s85_s23 = sshll.u32 %s146_s1, 4  ;;  %s147_s0 = smov 128   ;;  %s86_s23 = int_to_ptr.vmem [resolvable:$true] %s85_s23 }
   0xc   :  { %46 = vmatpush.msra.mxu0 %v35_v5  ;;  %104 = vmatpush.msra.mxu1 %v35_v5  ;;  %v119_v18 = vld [vmem:[%s231_s2] ss:$0 sm:$0xff] }
   0xe   :  { %47 = vmatpush.msra.mxu0 %v34_v6  ;;  %105 = vmatpush.msra.mxu1 %v34_v6 }
  0x10   :  { %48 = vmatpush.msra.mxu0 %v33_v7  ;;  %106 = vmatpush.msra.mxu1 %v33_v7 }
  0x12   :  { %49 = vmatpush.msra.mxu0 %v32_v8  ;;  %107 = vmatpush.msra.mxu1 %v32_v8 }
  0x14   :  { %50 = vmatpush.msra.mxu0 %v31_v9  ;;  %108 = vmatpush.msra.mxu1 %v31_v9 }
  0x16   :  { %51 = vmatpush.msra.mxu0 %v30_v10  ;;  %109 = vmatpush.msra.mxu1 %v30_v10 }
  0x18   :  { %52 = vmatpush.msra.mxu0 %v29_v11  ;;  %110 = vmatpush.msra.mxu1 %v29_v11 }
  0x1a   :  { %53 = vmatpush.msra.mxu0 %v28_v12  ;;  %111 = vmatpush.msra.mxu1 %v28_v12 }
  0x1c   :  { %54 = vmatpush.msra.mxu0 %v27_v13  ;;  %112 = vmatpush.msra.mxu1 %v27_v13 }
  0x1e   :  { %55 = vmatpush.msra.mxu0 %v26_v14  ;;  %113 = vmatpush.msra.mxu1 %v26_v14 }
  0x20   :  { %56 = vmatpush.msra.mxu0 %v25_v15  ;;  %114 = vmatpush.msra.mxu1 %v25_v15 }
  0x21   :  { %57 = vmatmul.f32.vlgmr.msra.gmra.mxu0 %v23_v16  ;;  %60 = vmatmul.f32.vlgmr.msra.gmra.mxu1 %v24_v17 }
  0x9e   :  { %v58_v19 = vpop.f32.mrf.mxu0  ;;  %v61_v20 = vpop.f32.mrf.mxu1 }
  0x9f   :  { %v77_v21 = vadd.f32 %v119_v18, %v58_v19  ;;  %v78_v22 = vadd.f32 %v119_v18, %v61_v20 }
  0xa1   :  { %79 = vst [vmem:[#allocation2] sm:$0xff] %v77_v21 }
  0xa2   :  { %80 = vst [vmem:[#allocation2 + $0x8] sm:$0xff] %v78_v22 }
  0xa3   :  { %93 = dma.vmem_to_hbm [thread:$0]  %s86_s23, 256, %s88_s26, [#allocation3], %s147_s0, %s147_s0, %s148_s27  }
  0xa4   :  { %144 = dma.done.wait [#allocation3], 256  }
  0xa5   :  { %145 = vsyncadd [#allocation3], 4294967040 }
  0xa6   :  { %98 = vsyncpa [#allocation3], 1 }

</bundles_post_ra>
